<compile_context>
chip_gen: v7x
topology: tpu7x:2x2x1
jax: 0.10.0
libtpu: 0.0.40
codegen_flags: <defaults>
</compile_context>

<pallas_src>
import functools

import jax
import jax.numpy as jnp
from jax.experimental import pallas as pl
from jax.experimental.pallas import tpu as pltpu


def _rmsnorm_gated_kernel(x_ref, g_ref, w_ref, o_ref, *, eps):
    # Compute in float32 (matches torch's .to(torch.float32)).
    x = x_ref[...].astype(jnp.float32)
    g = g_ref[...].astype(jnp.float32)
    # silu(gate) gating (sigmoid goes to the EUP slot -> near free)
    x = x * (g * jax.nn.sigmoid(g))
    # variance over the last (hidden / lane) axis
    var = jnp.mean(x * x, axis=-1, keepdims=True)
    x = x * jax.lax.rsqrt(var + eps)
    # Match torch exactly: cast normalized activations back to the input dtype,
    # then multiply by weight (type promotion decides the final dtype).
    o_ref[...] = (w_ref[...] * x.astype(x_ref.dtype)).astype(o_ref.dtype)


def _rmsnorm_kernel(x_ref, w_ref, o_ref, *, eps):
    x = x_ref[...].astype(jnp.float32)
    var = jnp.mean(x * x, axis=-1, keepdims=True)
    x = x * jax.lax.rsqrt(var + eps)
    o_ref[...] = (w_ref[...] * x.astype(x_ref.dtype)).astype(o_ref.dtype)


def _vmem_capacity_bytes():
    """Physical VMEM per TensorCore; conservative fallback (v7x = 64 MiB)."""
    try:
        return int(pltpu.get_tpu_info().vmem_capacity_bytes)
    except Exception:
        return 64 * 1024 * 1024


def _sublane_align(dtype):
    """Rows per packed sublane group: f32 -> 8, bf16 -> 16, int8/fp8 -> 32."""
    return max(8, 32 // jnp.dtype(dtype).itemsize)


def _round_up(x, m):
    return ((x + m - 1) // m) * m


def _choose_block_rows(n_rows, hidden, in_dtype, gate_dtype, out_dtype):
    """Pick a large, VMEM-fitting row tile; return (block_rows, per_row_resident_bytes)."""
    itemsize = lambda d: jnp.dtype(d).itemsize
    # VMEM resident bytes per row of a tile:
    #   double-buffered input / gate / output tiles
    # + ~2 live f32 in-kernel temporaries (gated x across the reduction, x*x).
    io_row = hidden * (
        itemsize(in_dtype)
        + (itemsize(gate_dtype) if gate_dtype is not None else 0)
        + itemsize(out_dtype)
    )
    tmp_row = 2 * hidden * 4
    per_row_resident = 2 * io_row + tmp_row

    vmem_cap = _vmem_capacity_bytes()
    budget = vmem_cap // 3                      # headroom for weight / compiler scratch
    max_rows_vmem = max(8, budget // per_row_resident)

    # Byte-based target: ~8 MiB per buffered input slab.  Amortizes the
    # ~0.35 us per-grid-step overhead even when `hidden` is small.
    target_rows = max(8, (8 << 20) // max(1, hidden * itemsize(in_dtype)))

    align = _sublane_align(in_dtype)
    block_rows = min(int(max_rows_vmem), int(target_rows))
    block_rows = max(align, (block_rows // align) * align)

    # Keep >= ~8 grid steps when n_rows permits, so the DMA pipeline has work
    # to overlap and both v7x TensorCores receive grid steps.
    min_steps = 8
    steps_cap = _round_up(pl.cdiv(n_rows, min_steps), align)
    block_rows = min(block_rows, max(align, steps_cap))

    # Never larger than the (sublane-rounded) problem itself.
    block_rows = min(block_rows, _round_up(n_rows, align))
    return int(block_rows), int(per_row_resident)


def mamba_rmsnorm_gated(hidden_states, weight, gate=None, eps=1e-6,
                        block_rows=None, out_dtype=None):
    """Pallas TPU implementation of MambaRMSNormGated.forward.

    out_dtype: opt-in override (e.g. jnp.bfloat16) to cut the output HBM
    stream; default follows the torch promotion (f32 weight * input dtype).
    """
    orig_shape = hidden_states.shape
    hidden = orig_shape[-1]
    in_dtype = hidden_states.dtype
    if out_dtype is None:
        # torch: weight (f32 param) * hidden_states.to(input_dtype) -> promoted dtype
        out_dtype = jnp.result_type(weight.dtype, in_dtype)

    # TODO(synk): for hidden < 128 the output is lane-sparse (masked vst);
    # if narrow hidden matters in production, pack k rows into one 128-lane
    # slab and do a segmented per-k reduction for lane-dense stores.
    x2d = hidden_states.reshape(-1, hidden)
    n_rows = x2d.shape[0]
    w2d = weight.reshape(1, hidden)
    gate_dtype = gate.dtype if gate is not None else None

    chosen_rows, per_row_resident = _choose_block_rows(
        n_rows, hidden, in_dtype, gate_dtype, out_dtype)
    if block_rows is None:
        block_rows = chosen_rows

    grid = (pl.cdiv(n_rows, block_rows),)
    row_spec = pl.BlockSpec((block_rows, hidden), lambda i: (i, 0))
    w_spec = pl.BlockSpec((1, hidden), lambda i: (0, 0))
    out_shape = jax.ShapeDtypeStruct((n_rows, hidden), out_dtype)

    # Scoped VMEM: enough for the double-buffered tiles + f32 temporaries +
    # slack, but capped well below physical VMEM (7/8) so compiler-internal
    # scratch still fits (critical on v7x's 64 MiB per TensorCore).
    vmem_cap = _vmem_capacity_bytes()
    needed = block_rows * per_row_resident + 8 * hidden * 4 + (4 << 20)
    vmem_limit = int(min((vmem_cap * 7) // 8, max(needed, 32 << 20)))
    cparams = pltpu.CompilerParams(
        dimension_semantics=("parallel",),
        vmem_limit_bytes=vmem_limit,
    )

    if gate is not None:
        g2d = gate.reshape(-1, hidden)
        out = pl.pallas_call(
            functools.partial(_rmsnorm_gated_kernel, eps=eps),
            out_shape=out_shape,
            grid_spec=pltpu.PrefetchScalarGridSpec(
                num_scalar_prefetch=0,
                grid=grid,
                in_specs=[row_spec, row_spec, w_spec],
                out_specs=row_spec,
            ),
            compiler_params=cparams,
        )(x2d, g2d, w2d)
    else:
        out = pl.pallas_call(
            functools.partial(_rmsnorm_kernel, eps=eps),
            out_shape=out_shape,
            grid_spec=pltpu.PrefetchScalarGridSpec(
                num_scalar_prefetch=0,
                grid=grid,
                in_specs=[row_spec, w_spec],
                out_specs=row_spec,
            ),
            compiler_params=cparams,
        )(x2d, w2d)

    return out.reshape(orig_shape[:-1] + (hidden,)).astype(out_dtype).reshape(orig_shape)


def _reference(hidden_states, weight, gate=None, eps=1e-6):
    in_dtype = hidden_states.dtype
    x = hidden_states.astype(jnp.float32)
    if gate is not None:
        g = gate.astype(jnp.float32)
        x = x * (g * jax.nn.sigmoid(g))
    var = jnp.mean(x * x, axis=-1, keepdims=True)
    x = x * jax.lax.rsqrt(var + eps)
    return weight * x.astype(in_dtype)


if __name__ == "__main__":
    key = jax.random.PRNGKey(0)
    batch, seq, hidden = 2, 8, 32
    k1, k2 = jax.random.split(key)
    hidden_states = jax.random.normal(k1, (batch, seq, hidden), dtype=jnp.float32)
    gate = jax.random.normal(k2, (batch, seq, hidden), dtype=jnp.float32)
    # Deterministic parameter init, matching nn.Parameter(torch.ones(hidden_size))
    weight = jnp.ones((hidden,), dtype=jnp.float32)

    out = mamba_rmsnorm_gated(hidden_states, weight, gate=gate, eps=1e-6)
    out = jax.block_until_ready(out)

    ref = _reference(hidden_states, weight, gate=gate, eps=1e-6)
    assert out.shape == (batch, seq, hidden)
    assert out.dtype == ref.dtype
    assert jnp.allclose(out, ref, atol=1e-5, rtol=1e-5), "mismatch vs reference"

    # Also exercise the gate=None path.
    out_ng = jax.block_until_ready(mamba_rmsnorm_gated(hidden_states, weight, gate=None))
    ref_ng = _reference(hidden_states, weight, gate=None)
    assert jnp.allclose(out_ng, ref_ng, atol=1e-5, rtol=1e-5), "mismatch vs reference (no gate)"

    # Exercise a shape whose row count does NOT divide the chosen tile
    # (tail tile handled by Pallas masking) and a bf16 input (output dtype
    # follows jnp/torch promotion with the f32 weight -> f32).
    k3, k4 = jax.random.split(k2)
    hs2 = jax.random.normal(k3, (3, 7, hidden), dtype=jnp.bfloat16)
    g2 = jax.random.normal(k4, (3, 7, hidden), dtype=jnp.bfloat16)
    out2 = jax.block_until_ready(mamba_rmsnorm_gated(hs2, weight, gate=g2))
    ref2 = _reference(hs2, weight, gate=g2)
    assert out2.shape == (3, 7, hidden)
    assert jnp.allclose(out2.astype(jnp.float32), ref2.astype(jnp.float32),
                        atol=2e-2, rtol=2e-2), "mismatch vs reference (bf16, ragged rows)"

    # Opt-in bf16 output (cuts the largest HBM stream for bf16 models).
    out3 = jax.block_until_ready(
        mamba_rmsnorm_gated(hs2, weight, gate=g2, out_dtype=jnp.bfloat16))
    assert out3.dtype == jnp.bfloat16
    assert jnp.allclose(out3.astype(jnp.float32), ref2.astype(jnp.float32),
                        atol=3e-2, rtol=3e-2), "mismatch vs reference (bf16 out)"

    print("KERNEL_OK")
</pallas_src>

<mosaic_0001>
module attributes {stable_mosaic.version = 11 : i64} {
  func.func @_rmsnorm_gated_kernel(%arg0: i32, %arg1: memref<8x32xf32, #tpu.memory_space<vmem>>, %arg2: memref<8x32xf32, #tpu.memory_space<vmem>>, %arg3: memref<1x32xf32, #tpu.memory_space<vmem>>, %arg4: memref<8x32xf32, #tpu.memory_space<vmem>>) attributes {dimension_semantics = [#tpu.dimension_semantics<parallel>], iteration_bounds = array<i64: 2>, scalar_prefetch = 0 : i64, scratch_operands = 0 : i64, tpu.core_type = #tpu.core_type<tc>, window_params = [{transform_indices = @transform_0, window_bounds = array<i64: 8, 32>}, {transform_indices = @transform_1, window_bounds = array<i64: 8, 32>}, {pipeline_mode = #tpu.pipeline_mode<synchronous>, transform_indices = @transform_2, window_bounds = array<i64: 1, 32>}, {transform_indices = @transform_3, window_bounds = array<i64: 8, 32>}]} {
    %c0 = arith.constant 0 : index
    %c0_0 = arith.constant 0 : index
    %0 = vector.load %arg1[%c0, %c0_0] : memref<8x32xf32, #tpu.memory_space<vmem>>, vector<8x32xf32>
    %c0_1 = arith.constant 0 : index
    %c0_2 = arith.constant 0 : index
    %1 = vector.load %arg2[%c0_1, %c0_2] : memref<8x32xf32, #tpu.memory_space<vmem>>, vector<8x32xf32>
    %2 = arith.negf %1 : vector<8x32xf32>
    %3 = math.exp %2 : vector<8x32xf32>
    %cst = arith.constant 1.000000e+00 : f32
    %4 = vector.broadcast %cst : f32 to vector<8x32xf32>
    %5 = arith.addf %4, %3 : vector<8x32xf32>
    %6 = arith.divf %4, %5 : vector<8x32xf32>
    %7 = arith.mulf %1, %6 : vector<8x32xf32>
    %8 = arith.mulf %0, %7 : vector<8x32xf32>
    %9 = arith.mulf %8, %8 : vector<8x32xf32>
    %cst_3 = arith.constant dense<0.000000e+00> : vector<8xf32>
    %10 = vector.multi_reduction <add>, %9, %cst_3 [1] : vector<8x32xf32> to vector<8xf32>
    %11 = vector.shape_cast %10 : vector<8xf32> to vector<8x1xf32>
    %cst_4 = arith.constant 3.200000e+01 : f32
    %12 = vector.broadcast %cst_4 : f32 to vector<8x1xf32>
    %13 = arith.divf %11, %12 : vector<8x1xf32>
    %cst_5 = arith.constant 9.99999997E-7 : f32
    %14 = vector.broadcast %cst_5 : f32 to vector<8x1xf32>
    %15 = arith.addf %13, %14 : vector<8x1xf32>
    %16 = math.rsqrt %15 : vector<8x1xf32>
    %17 = vector.broadcast %16 : vector<8x1xf32> to vector<8x32xf32>
    %18 = arith.mulf %8, %17 : vector<8x32xf32>
    %c0_6 = arith.constant 0 : index
    %c0_7 = arith.constant 0 : index
    %19 = vector.load %arg3[%c0_6, %c0_7] : memref<1x32xf32, #tpu.memory_space<vmem>>, vector<1x32xf32>
    %20 = vector.broadcast %19 : vector<1x32xf32> to vector<8x32xf32>
    %21 = arith.mulf %20, %18 : vector<8x32xf32>
    %c0_8 = arith.constant 0 : index
    %c0_9 = arith.constant 0 : index
    %22 = vector.load %arg4[%c0_8, %c0_9] : memref<8x32xf32, #tpu.memory_space<vmem>>, vector<8x32xf32>
    tpu.vector_store %arg4[%c0_8, %c0_9], %21 {strides = array<i32>} : memref<8x32xf32, #tpu.memory_space<vmem>>, vector<8x32xf32>,
    return
  }
  func.func @transform_0(%arg0: i32) -> (i32, i32) {
    %c0_i32 = arith.constant 0 : i32
    %c0_i32_0 = arith.constant 0 : i32
    return %arg0, %c0_i32 : i32, i32
  }
  func.func @transform_1(%arg0: i32) -> (i32, i32) {
    %c0_i32 = arith.constant 0 : i32
    %c0_i32_0 = arith.constant 0 : i32
    return %arg0, %c0_i32 : i32, i32
  }
  func.func @transform_2(%arg0: i32) -> (i32, i32) {
    %c0_i32 = arith.constant 0 : i32
    %c0_i32_0 = arith.constant 0 : i32
    %c0_i32_1 = arith.constant 0 : i32
    return %c0_i32, %c0_i32_0 : i32, i32
  }
  func.func @transform_3(%arg0: i32) -> (i32, i32) {
    %c0_i32 = arith.constant 0 : i32
    %c0_i32_0 = arith.constant 0 : i32
    return %arg0, %c0_i32 : i32, i32
  }
}

</mosaic_0001>

<bundles_post_ra>
// kernel: tpu_custom_call.1
= control target key start
LH: loop header
LB: loop body
LE: loop exit
PB: predicated region body
PF: predicated region fallthrough
CT: control target
= control target key end

     0   :  { %8 = vsyncpa [#allocation3], 0  ;;  %s807_s0 = inlined_call_operand.hbm [shape: f32[16,32], index: 0, kind: input, shape index: {}]   ;;  %s808_s1 = inlined_call_operand.hbm [shape: f32[16,32], index: 1, kind: input, shape index: {}]   ;;  %s809_s2 = inlined_call_operand.vmem [shape: f32[1,32], index: 2, kind: input, shape index: {}]   ;;  %s810_s3 = inlined_call_operand.hbm [shape: f32[16,32], index: 3, kind: output, shape index: {}]  }
   0x1   :  { %10 = vsyncpa [#allocation3 + $0x1], 0 }
   0x2   :  { %11 = vsyncpa [#allocation6], 0 }
   0x3   :  { %13 = vsyncpa [#allocation6 + $0x1], 0 }
   0x4   :  { %14 = vsyncpa [#allocation4], 0 }
   0x5   :  { %16 = vsyncpa [#allocation4 + $0x1], 0  ;;  %s588_s12 = smov 0   ;;  %s590_s13 = smov 0  }
   0x6   :  { %s592_s14 = smov 0   ;;  %s594_s15 = smov 0  }
   0x7 LB: > { %s609_s16 = sadd.s32 4294967295, %s563_s15   ;;  %s359_s17 = sadd.s32 4294967294, %s563_s15   ;;  %s563_s15 = sphi %s594_s15, %s829_s15   ;;  %s559_s14 = sphi %s592_s14, %s828_s14   ;;  %s555_s13 = sphi %s590_s13, %s827_s13   ;;  %s551_s12 = sphi %s588_s12, %s826_s12  }
   0x8   : > { %s613_s18 = sadd.s32 1, %s563_s15   ;;  %s29_s19 = sadd.s32 1, %s559_s14 }
   0x9   : > { %s26_s20 = ssub.s32 %s563_s15, %s613_s18  ;;  %p36_p0 = scmp.ne.s32.totalorder %s559_s14, %s555_s13 }
   0xa   : > { %p27_p1 = scmp.eq.s32.totalorder %s26_s20, 0  ;;  %p37_p2 = scmp.eq.s32.totalorder %s563_s15, 0 }
   0xb   : > { %p42_p3 = scmp.ne.s32.totalorder %s555_s13, %s551_s12  ;;  %p43_p4 = scmp.eq.s32.totalorder %s609_s16, 0 }
   0xc   : > { %s625_s21 = scalar_select %p27_p1, %s559_s14, %s29_s19  }
   0xd   : > { %p627_p5 = por %p37_p2, %p36_p0  ;;  %p631_p6 = por %p43_p4, %p42_p3 }
   0xe   : > { %p113_p7 = scmp.eq.s32.totalorder %s609_s16, 1  ;;  %p119_p8 = scmp.eq.s32.totalorder %s359_s17, 1 }
   0xf   : > { %s814_s23 = scalar_select %p631_p6, 1, 0 }
  0x10   : > { %p393_p10 = scmp.lt.s32.totalorder %s563_s15, 2  ;;  %p638_p11 = por %p113_p7, %p36_p0 }
  0x11   : > { %p642_p12 = por %p119_p8, %p42_p3  ;;  %s647_s26 = sand.u32 1, %s559_s14  }
  0x12   : > { %s815_s24 = scalar_select %p638_p11, 1, 0 }
  0x13   : > { %s816_s25 = scalar_select %p642_p12, 1, 0 }
  0x14   : > { %s363_s27 = sshll.u32 %s563_s15, 7  ;;  %s362_s28 = sshll.u32 %s647_s26, 3 }
  0x15   : > { %s656_s4 = scalar_lea.hbm %s807_s0, %s363_s27  ;;  %s146_s5 = scalar_lea.vmem [#allocation2], %s362_s28 }
  0x16   : > { %s153_s6 = sshll.u32 %s146_s5, 4  ;;  %p662_p13 = pnand %p393_p10, %p627_p5  ;;  %s666_s6 = int_to_ptr.vmem [resolvable:$true] %s153_s6 }
  0x17   : > { %s143_s8 = scalar_lea.sflag [#allocation3], %s647_s26  ;;  %s433_s9 = scalar_lea.hbm %s656_s4, 128 }
  0x18   : > { %p434_p2 = scmp.ne.s32.totalorder %s656_s4, %s433_s9  ;;  %p435_p3 = pneg %p662_p13 }
  0x19   : > { %s438_s17 = scalar_lea.hbm %s807_s0, 256  ;;  %p439_p5 = scmp.lt.u32.totalorder %s656_s4, %s807_s0 }
  0x1a   : > { %p436_p4 = pnand %p435_p3, %p434_p2  ;;  %p440_p8 = scmp.lt.u32.totalorder %s438_s17, %s433_s9 }
  0x1b   : > { %p442_p9 = scmp.lt.u32.totalorder %s433_s9, %s656_s4 }
  0x1c   : > { %p437_p7 = pneg %p436_p4  ;;  %p441_p10 = por %p440_p8, %p439_p5 }
  0x1e   : > { %p443_p0 = por %p442_p9, %p441_p10 }
  0x20   : > { %p444_p1 = pnand %p443_p0, %p437_p7 }
  0x22   : > { %447 = shalt.err (!%p444_p1)
}
  0x23   : > { %s448_s22 = scalar_lea.vmem %s666_s6, 128  ;;  %s565_s29 = smov [#allocation2]  }
  0x24   : > { %p449_p2 = scmp.ne.s32.totalorder %s666_s6, %s448_s22  ;;  %s453_s30 = sshll.u32 %s565_s29, 4  ;;  %s454_s30 = int_to_ptr.vmem [resolvable:$false] %s453_s30 }
  0x25   : > { %s455_s5 = scalar_lea.vmem %s454_s30, 256  ;;  %p456_p11 = scmp.lt.s32.totalorder %s666_s6, %s454_s30 }
  0x26   : > { %p451_p4 = pnand %p449_p2, %p435_p3  ;;  %p457_p5 = scmp.lt.s32.totalorder %s455_s5, %s448_s22 }
  0x28   : > { %p452_p12 = pneg %p451_p4  ;;  %p458_p8 = por %p457_p5, %p456_p11 }
  0x2a   : > { %p459_p9 = pnand %p458_p8, %p452_p12 }
  0x2c   : > { %462 = shalt.err (!%p459_p9)
}
  0x2d   : > { %385 = dma.hbm_to_vmem [thread:$0]  (!%p662_p13), %s656_s4, 128, %s666_s6, %s143_s8  }
  0x2e   : > { %p818_p0 = scmp.lt.s32.totalorder %s563_s15, 3  ;;  %p819_p1 = scmp.ge.s32.totalorder %s563_s15, 1 }
  0x2f   : > { %s709_s17 = scalar_lea.hbm %s808_s1, %s363_s27  ;;  %s164_s19 = scalar_lea.vmem [#allocation5], %s362_s28 }
  0x30   : > { %p700_p7 = pnand %p819_p1, %p818_p0  ;;  %s171_s20 = sshll.u32 %s164_s19, 4  ;;  %s172_s20 = int_to_ptr.vmem [resolvable:$true] %s171_s20 }
  0x31   : > { %s161_s4 = scalar_lea.sflag [#allocation6], %s647_s26  ;;  %s463_s6 = scalar_lea.hbm %s709_s17, 128 }
  0x32   : > { %s820_s9 = scalar_select %p700_p7, 1, 0 }
  0x33   : > { %p464_p11 = scmp.ne.s32.totalorder %s709_s17, %s463_s6  ;;  %s468_s27 = scalar_lea.hbm %s808_s1, 256 }
  0x34   : > { %p469_p2 = scmp.lt.u32.totalorder %s709_s17, %s808_s1  ;;  %p470_p4 = scmp.lt.u32.totalorder %s468_s27, %s463_s6 }
  0x35   : > { %p466_p12 = pnand %p464_p11, %p435_p3  ;;  %p472_p8 = scmp.lt.u32.totalorder %s463_s6, %s709_s17 }
  0x36   : > { %p471_p5 = por %p470_p4, %p469_p2 }
  0x37   : > { %p467_p10 = pneg %p466_p12 }
  0x38   : > { %p473_p9 = por %p472_p8, %p471_p5 }
  0x3a   : > { %p474_p0 = pnand %p473_p9, %p467_p10 }
  0x3c   : > { %477 = shalt.err (!%p474_p0)
}
  0x3d   : > { %s478_s26 = scalar_lea.vmem %s172_s20, 128  ;;  %s566_s28 = smov [#allocation5]  }
  0x3e   : > { %p479_p1 = scmp.ne.s32.totalorder %s172_s20, %s478_s26  ;;  %s483_s5 = sshll.u32 %s566_s28, 4  ;;  %s484_s5 = int_to_ptr.vmem [resolvable:$false] %s483_s5 }
  0x3f   : > { %s485_s10 = scalar_lea.vmem %s484_s5, 256  ;;  %p486_p6 = scmp.lt.s32.totalorder %s172_s20, %s484_s5 }
  0x40   : > { %p481_p11 = pnand %p479_p1, %p435_p3  ;;  %p487_p7 = scmp.lt.s32.totalorder %s485_s10, %s478_s26 }
  0x42   : > { %p482_p12 = pneg %p481_p11  ;;  %p488_p2 = por %p487_p7, %p486_p6 }
  0x44   : > { %p489_p4 = pnand %p488_p2, %p482_p12 }
  0x46   : > { %492 = shalt.err (!%p489_p4)
}
  0x47   : > { %388 = dma.hbm_to_vmem [thread:$0]  (!%p662_p13), %s709_s17, 128, %s172_s20, %s161_s4  }
  0x48   : > { %p821_p10 = scmp.ne.s32.totalorder %s820_s9, 0 }
  0x49   : > { %s736_s11 = sand.u32 (!%p821_p10), 1, %s555_s13   ;;  %p822_p6 = scmp.ne.s32.totalorder (!%p821_p10), %s814_s23, 0 }
  0x4a   : > { %180 = sbr.rel (%p821_p10) target bundleno = 293 (0x125), region = 32  ;;  %s739_s19 = sshll.u32 (!%p821_p10), %s736_s11, 3 }
  0x4b   : > { %s183_s6 = scalar_lea.sflag (!%p821_p10), [#allocation3], %s736_s11  ;;  %s186_s8 = scalar_lea.vmem (!%p821_p10), [#allocation2], %s739_s19 }
  0x51   : > { %538 = dma.done.wait (%p822_p6), %s183_s6, 128  }
  0x52   : > { %540 = vsyncadd (%p822_p6), %s183_s6, 4294967168  ;;  %s192_s7 = scalar_lea.sflag [#allocation6], %s736_s11  ;;  %s195_s9 = scalar_lea.vmem [#allocation5], %s739_s19 }
  0x53   : > { %542 = dma.done.wait (%p822_p6), %s192_s7, 128  }
  0x54   : > { %544 = vsyncadd (%p822_p6), %s192_s7, 4294967168  ;;  %v224_v0 = vld [vmem:[%s195_s9] sm:$0xff]  ;;  %v223_v5 = vld [vmem:[%s186_s8] sm:$0xff]  ;;  %vm234_vm0 = vcmask 261120   ;;  %s373_s20 = sshll.u32 %s609_s16, 7  ;;  %s222_s4 = scalar_lea.vmem [#allocation7], %s739_s19 }
  0x55   : > { %v370_v1 = vmul.f32 -1.442695, %v224_v0  ;;  %v371_v14 = vld [vmem:[%s809_s2] ss:$0 sm:$0xff]  ;;  %s266_s22 = sshll.u32 %s222_s4, 4  ;;  %s762_s30 = scalar_lea.hbm %s810_s3, %s373_s20  ;;  %s764_s22 = int_to_ptr.vmem [resolvable:$true] %s266_s22 }
  0x56   : > { %s253_s26 = scalar_lea.sflag [#allocation4], %s736_s11  ;;  %s493_s28 = scalar_lea.vmem %s764_s22, 128 }
  0x57   : > { %427 = vpow2.f32 %v370_v1  ;;  %p494_p13 = scmp.ne.s32.totalorder %s764_s22, %s493_s28  ;;  %p823_p3 = scmp.ne.s32.totalorder %s815_s24, 0 }
  0x58   : > { %s567_s16 = smov [#allocation7]  }
  0x59   : > { %p495_p7 = pnand %p494_p13, %p823_p3  ;;  %s497_s5 = sshll.u32 %s567_s16, 4  ;;  %s498_s5 = int_to_ptr.vmem [resolvable:$false] %s497_s5 }
  0x5a   : > { %s499_s10 = scalar_lea.vmem %s498_s5, 256  ;;  %p500_p8 = scmp.lt.s32.totalorder %s764_s22, %s498_s5 }
  0x5b   : > { %p496_p5 = pneg %p495_p7  ;;  %p501_p9 = scmp.lt.s32.totalorder %s499_s10, %s493_s28 }
  0x5d   : > { %p502_p0 = por %p501_p9, %p500_p8 }
  0x5f   : > { %p503_p1 = pnand %p502_p0, %p496_p5 }
  0x61   : > { %v428_v2 = vpop.eup %427 }
  0x62   : > { %v228_v3 = vadd.f32 1.0, %v428_v2 }
  0x64   : > { %429 = vrcp.f32 %v228_v3 }
  0x6e   : > { %v430_v4 = vpop.eup %429 }
  0x6f   : > { %v231_v6 = vmul.f32 %v430_v4, %v224_v0 }
  0x71   : > { %v232_v7 = vmul.f32 %v231_v6, %v223_v5 }
  0x73   : > { %v233_v8 = vmul.f32 %v232_v7, %v232_v7 }
  0x75   : > { %v235_v9 = vsel %vm234_vm0, %v233_v8, 0.0 }
  0x76   : > { %236 = vadd.xlane.f32.xlu0 %v235_v9 }
 0x103   : > { %v237_v10 = vpop.xlane.xlu0 %236 }
 0x104   : > { %v239_v11 = vmul.f32 0.03125, %v237_v10 }
 0x106   : > { %v240_v12 = vadd.f32 1e-06, %v239_v11 }
 0x108   : > { %431 = vrsqrt.f32 %v240_v12 }
 0x112   : > { %v432_v13 = vpop.eup %431 }
 0x113   : > { %v242_v15 = vmul.f32 %v432_v13, %v232_v7 }
 0x115   : > { %v250_v16 = vmul.f32 %v371_v14, %v242_v15 }
 0x117   : > { %251 = vst.msk [vmem:[%s222_s4] sm:$0xff] %vm234_vm0, %v250_v16 }
 0x118   : > { %506 = shalt.err (!%p503_p1)
}
 0x119   : > { %s507_s11 = scalar_lea.hbm %s762_s30, 128  ;;  %s511_s8 = scalar_lea.hbm %s810_s3, 256 }
 0x11a   : > { %p508_p11 = scmp.ne.s32.totalorder %s762_s30, %s507_s11  ;;  %p512_p4 = scmp.lt.u32.totalorder %s762_s30, %s810_s3 }
 0x11b   : > { %p513_p10 = scmp.lt.u32.totalorder %s511_s8, %s507_s11  ;;  %p515_p13 = scmp.lt.u32.totalorder %s507_s11, %s762_s30 }
 0x11c   : > { %p509_p12 = pnand %p508_p11, %p823_p3 }
 0x11d   : > { %p514_p6 = por %p513_p10, %p512_p4 }
 0x11e   : > { %p510_p2 = pneg %p509_p12 }
 0x11f   : > { %p516_p7 = por %p515_p13, %p514_p6 }
 0x121   : > { %p517_p5 = pnand %p516_p7, %p510_p2 }
 0x123   : > { %520 = shalt.err (!%p517_p5)
}
 0x124   : > { %380 = dma.vmem_to_hbm [thread:$0]  (%p823_p3), %s764_s22, 128, %s762_s30, %s253_s26  }
 0x125 PF: > { %s278_s23 = sand.u32 1, %s551_s12   ;;  %p824_p8 = scmp.ne.s32.totalorder %s816_s25, 0 }
 0x126   : > { %p825_p9 = scmp.ge.s32.totalorder %s563_s15, 2  ;;  %s279_s17 = scalar_lea.sflag [#allocation4], %s278_s23 }
 0x128   : > { %p390_p0 = pnand %p825_p9, %p824_p8 }
 0x12a   : > { %546 = dma.done.wait (!%p390_p0), %s279_s17, 128  }
 0x12b   : > { %548 = vsyncadd (!%p390_p0), %s279_s17, 4294967168  ;;  %p19_p1 = scmp.ge.s32.totalorder %s613_s18, 4   ;;  %s826_s12 = smov %s555_s13 }
 0x12c   : > { %s827_s13 = smov %s559_s14  ;;  %s828_s14 = smov %s625_s21 }
 0x12d   : > { %s829_s15 = smov %s613_s18  ;;  %21 = sbr.rel (!%p19_p1) target bundleno = 7 (0x7), region = 90 }
 0x134   :  { %284 = vsyncpa [#allocation3], 1 }
 0x135   :  { %286 = vsyncpa [#allocation3 + $0x1], 1 }
 0x136   :  { %287 = vsyncpa [#allocation6], 1 }
 0x137   :  { %289 = vsyncpa [#allocation6 + $0x1], 1 }
 0x138   :  { %290 = vsyncpa [#allocation4], 1 }
 0x139   :  { %292 = vsyncpa [#allocation4 + $0x1], 1 }

</bundles_post_ra>
